<compile_context>
chip_gen: v5e
topology: v5e:2x2
jax: 0.10.0
libtpu: 0.0.40
codegen_flags: <defaults>
</compile_context>

<pallas_src>
import functools

import jax
import jax.numpy as jnp
from jax import lax
from jax.experimental import pallas as pl
from jax.experimental.pallas import tpu as pltpu


NUM_LABELS = 30
NUM_BINARY = 2
SLAB = 128          # lane-dense output width (one full vreg of lanes)
HALF = SLAB // 2    # l1/bin copy lives in the upper half -> half rotation aligns it


def _round_up(x, m):
    return ((x + m - 1) // m) * m


# ---------------------------------------------------------------------------
# Kernels
# ---------------------------------------------------------------------------
def _aux_head_kernel(x_ref, wx_ref, wt_ref, b_ref, out_ref):
    """Default (v6e/v7x) path: two full-width MXU pushes per batch tile."""
    x = x_ref[...].astype(jnp.float32)

    # Fused slab: lanes [0:30]=l0, [30:32]=bin, [64:94]=l1, [94:96]=bin, rest 0.
    fused = (
        jnp.dot(x, wx_ref[...], preferred_element_type=jnp.float32)
        + jnp.dot(jnp.tanh(x), wt_ref[...], preferred_element_type=jnp.float32)
        + b_ref[...]
    )

    # torch.argmax over the 2 binary logits: class 1 iff logit[1] > logit[0]
    # (ties -> 0, matching torch.argmax first-occurrence behavior).
    sel = fused[:, NUM_LABELS + 1:NUM_LABELS + 2] > fused[:, NUM_LABELS:NUM_LABELS + 1]

    # Half-vreg rotation brings [l1 | bin] into lanes [0:32]; one full-width select
    # routes each row; the store is a single unmasked 128-lane write.
    rolled = pltpu.roll(fused, shift=HALF, axis=1)
    out_ref[...] = jnp.where(sel, rolled, fused)


def _aux_head_kernel_v5e(x_ref, wx_ref, wbr_ref, b_ref, out_ref):
    """v5e path: single MXU pass; binary logits on VPU/XLU (wt was 97% zero columns)."""
    x = x_ref[...].astype(jnp.float32)

    # One full-width MXU push: lanes [0:30]=l0, [64:94]=l1; binary lanes hold only bias.
    fused = jnp.dot(x, wx_ref[...], preferred_element_type=jnp.float32) + b_ref[...]

    # Binary logits = tanh(x) @ Wb^T computed as broadcast-mul + cross-lane reduce
    # (VPU + XLU slots; frees half of all MXU pushes, the binding unit on v5e in f32).
    t = jnp.tanh(x)
    wbr = wbr_ref[...].astype(jnp.float32)                       # (2, H)
    bin0 = jnp.sum(t * wbr[0:1, :], axis=-1, keepdims=True)      # (tb, 1)
    bin1 = jnp.sum(t * wbr[1:2, :], axis=-1, keepdims=True)      # (tb, 1)

    # Merge into lanes 30/94 (bin0) and 31/95 (bin1) of the slab.
    lane = lax.broadcasted_iota(jnp.int32, fused.shape, 1) % HALF
    fused = fused + jnp.where(lane == NUM_LABELS, bin0,
                              jnp.where(lane == NUM_LABELS + 1, bin1, 0.0))

    sel = fused[:, NUM_LABELS + 1:NUM_LABELS + 2] > fused[:, NUM_LABELS:NUM_LABELS + 1]
    rolled = pltpu.roll(fused, shift=HALF, axis=1)
    out_ref[...] = jnp.where(sel, rolled, fused)


# ---------------------------------------------------------------------------
# One-time parameter packing (outside the per-call hot path)
# ---------------------------------------------------------------------------
def pack_auxiliary_head_params(wb, bb, w0, b0, w1, b1):
    """Pack nn.Linear-style params (out,in)/(out,) into the fused slab layout."""
    H = w0.shape[1]
    f32 = jnp.float32
    wx = jnp.zeros((H, SLAB), f32)
    wx = wx.at[:, 0:NUM_LABELS].set(w0.astype(f32).T)
    wx = wx.at[:, HALF:HALF + NUM_LABELS].set(w1.astype(f32).T)
    wt = jnp.zeros((H, SLAB), f32)
    wt = wt.at[:, NUM_LABELS:NUM_LABELS + NUM_BINARY].set(wb.astype(f32).T)
    wt = wt.at[:, HALF + NUM_LABELS:HALF + NUM_LABELS + NUM_BINARY].set(wb.astype(f32).T)
    b = jnp.zeros((1, SLAB), f32)
    b = b.at[0, 0:NUM_LABELS].set(b0.astype(f32))
    b = b.at[0, NUM_LABELS:NUM_LABELS + NUM_BINARY].set(bb.astype(f32))
    b = b.at[0, HALF:HALF + NUM_LABELS].set(b1.astype(f32))
    b = b.at[0, HALF + NUM_LABELS:HALF + NUM_LABELS + NUM_BINARY].set(bb.astype(f32))
    wbr = wb.astype(f32)                 # (2, H) rows, used by the v5e kernel variant
    return wx, wt, b, wbr


# ---------------------------------------------------------------------------
# Generation-aware tiling / VMEM budgeting
# ---------------------------------------------------------------------------
def _vmem_bytes(tb, H):
    return (2 * tb * H * 4          # double-buffered x tile
            + 2 * tb * SLAB * 4     # double-buffered out tile
            + 4 * H * SLAB * 4      # wx + wt (double-buffered, grid-invariant)
            + tb * H * 4            # in-kernel tanh(x) f32 temp
            + 3 * tb * SLAB * 4)    # fused / rolled / select temps


def _device_kind():
    try:
        return jax.devices()[0].device_kind.lower()
    except Exception:
        return ""


def _select_tile(B, H, kind):
    is_v5e = ("v5 lite" in kind) or ("v5e" in kind)
    is_v7 = "v7" in kind
    if is_v5e:
        tb_max = 512
    elif is_v7:
        tb_max = 1024
    elif "v6" in kind:
        tb_max = 2048
    else:
        tb_max = 1024
    b8 = _round_up(B, 8)
    if is_v7 and B > 256:
        # >= 4 grid steps: both TensorCores get work, DMA/compute overlap per core.
        tb = max(128, _round_up(pl.cdiv(B, 4), 8))
    else:
        tb = b8
    tb = min(tb, tb_max, b8)
    # VMEM budget: v7x has only 64 MiB physical per TC; v5e/v6e have 128 MiB.
    budget = (48 << 20) if is_v7 else (100 << 20)
    cap = (60 << 20) if is_v7 else (112 << 20)
    while _vmem_bytes(tb, H) > budget and tb > 8:
        tb = max(8, _round_up(tb // 2, 8))
    return tb, cap, is_v5e


# ---------------------------------------------------------------------------
# Wrapper
# ---------------------------------------------------------------------------
@functools.partial(jax.jit, static_argnames=("tile",))
def auxiliary_model_heads(x, wx, wt, b, wbr, tile=None):
    """x: (B, H) pooled features (f32 or bf16). wx/wt/b/wbr: pre-packed slab params.
    Returns (binary_logits (B, 2), routed label logits (B, 30)), both float32."""
    B, H = x.shape
    kind = _device_kind()
    tb, vmem_cap, is_v5e = _select_tile(B, H, kind)
    if tile is not None:                       # explicit override (tests / tuning)
        tb = min(max(8, _round_up(int(tile), 8)), _round_up(B, 8))

    grid = (pl.cdiv(B, tb),)                   # ragged last block: reads padded, writes masked
    vmem_limit = int(min(max(_vmem_bytes(tb, H) + (8 << 20), 32 << 20), vmem_cap))
    isz = jnp.dtype(x.dtype).itemsize

    if is_v5e:
        kernel = _aux_head_kernel_v5e
        w2, w2_spec = wbr, pl.BlockSpec((NUM_BINARY, H), lambda i: (0, 0))
        flops = 2 * B * H * SLAB + 4 * B * H
        w2_bytes = NUM_BINARY * H * 4
    else:
        kernel = _aux_head_kernel
        w2, w2_spec = wt, pl.BlockSpec((H, SLAB), lambda i: (0, 0))
        flops = 4 * B * H * SLAB
        w2_bytes = H * SLAB * 4

    out = pl.pallas_call(
        kernel,
        out_shape=jax.ShapeDtypeStruct((B, SLAB), jnp.float32),
        grid=grid,
        in_specs=[
            pl.BlockSpec((tb, H), lambda i: (i, 0)),        # x (batch-tiled)
            pl.BlockSpec((H, SLAB), lambda i: (0, 0)),      # wx (grid-invariant)
            w2_spec,                                        # wt or wb rows (grid-invariant)
            pl.BlockSpec((1, SLAB), lambda i: (0, 0)),      # bias (grid-invariant)
        ],
        out_specs=pl.BlockSpec((tb, SLAB), lambda i: (i, 0)),
        compiler_params=pltpu.CompilerParams(
            dimension_semantics=("parallel",),
            vmem_limit_bytes=vmem_limit),
        cost_estimate=pl.CostEstimate(
            flops=flops,
            transcendentals=B * H,
            bytes_accessed=B * H * isz + B * SLAB * 4 + H * SLAB * 4 + w2_bytes + SLAB * 4),
    )(x, wx, w2, b)

    binary_logits = out[:, NUM_LABELS:NUM_LABELS + NUM_BINARY]
    logits = out[:, :NUM_LABELS]
    return binary_logits, logits


# ---------------------------------------------------------------------------
# Pure-JAX reference of AuxiliaryModel.process() head path
# ---------------------------------------------------------------------------
def reference_heads(x, wb, bb, w0, b0, w1, b1):
    bin_logits = jnp.tanh(x) @ wb.T + bb
    labels = jnp.argmax(bin_logits, axis=1)
    l0 = x @ w0.T + b0
    l1 = x @ w1.T + b1
    logits = jnp.where(labels[:, None] == 0, l0, l1)
    return bin_logits, logits


if __name__ == "__main__":
    B, H = 8, 32   # small pooled-hidden shapes consistent with the module

    key = jax.random.PRNGKey(0)
    kx, kwb, kbb, kw0, kb0, kw1, kb1, kx2 = jax.random.split(key, 8)

    x = jax.random.normal(kx, (B, H), dtype=jnp.float32)
    # nn.Linear-style parameter shapes (out_features, in_features) / (out_features,)
    wb = jax.random.normal(kwb, (NUM_BINARY, H), dtype=jnp.float32) * 0.1
    bb = jax.random.normal(kbb, (NUM_BINARY,), dtype=jnp.float32) * 0.1
    w0 = jax.random.normal(kw0, (NUM_LABELS, H), dtype=jnp.float32) * 0.1
    b0 = jax.random.normal(kb0, (NUM_LABELS,), dtype=jnp.float32) * 0.1
    w1 = jax.random.normal(kw1, (NUM_LABELS, H), dtype=jnp.float32) * 0.1
    b1 = jax.random.normal(kb1, (NUM_LABELS,), dtype=jnp.float32) * 0.1

    # One-time packing, outside the per-call hot path.
    wx, wt, b, wbr = pack_auxiliary_head_params(wb, bb, w0, b0, w1, b1)
    jax.block_until_ready((wx, wt, b, wbr))

    # 1) Single-tile path.
    bin_logits, logits = auxiliary_model_heads(x, wx, wt, b, wbr)
    jax.block_until_ready((bin_logits, logits))
    ref_bin, ref_logits = reference_heads(x, wb, bb, w0, b0, w1, b1)
    assert bin_logits.shape == (B, NUM_BINARY)
    assert logits.shape == (B, NUM_LABELS)
    assert jnp.allclose(bin_logits, ref_bin, atol=1e-5, rtol=1e-5)
    assert jnp.allclose(logits, ref_logits, atol=1e-5, rtol=1e-5)

    # 2) Multi-step ragged grid path (no jnp.pad): B=20 with tile=8 -> grid=3,
    #    last block masked; exercises the pad-free boundary handling.
    B2 = 20
    x2 = jax.random.normal(kx2, (B2, H), dtype=jnp.float32)
    bin2, log2 = auxiliary_model_heads(x2, wx, wt, b, wbr, tile=8)
    jax.block_until_ready((bin2, log2))
    rbin2, rlog2 = reference_heads(x2, wb, bb, w0, b0, w1, b1)
    assert bin2.shape == (B2, NUM_BINARY) and log2.shape == (B2, NUM_LABELS)
    assert jnp.allclose(bin2, rbin2, atol=1e-5, rtol=1e-5)
    assert jnp.allclose(log2, rlog2, atol=1e-5, rtol=1e-5)

    print("KERNEL_OK")
</pallas_src>

<mosaic_0001>
module attributes {stable_mosaic.version = 11 : i64} {
  func.func @_aux_head_kernel(%arg0: i32, %arg1: memref<8x32xf32, #tpu.memory_space<vmem>>, %arg2: memref<32x128xf32, #tpu.memory_space<vmem>>, %arg3: memref<32x128xf32, #tpu.memory_space<vmem>>, %arg4: memref<1x128xf32, #tpu.memory_space<vmem>>, %arg5: memref<8x128xf32, #tpu.memory_space<vmem>>) attributes {dimension_semantics = [#tpu.dimension_semantics<parallel>], iteration_bounds = array<i64: 1>, scalar_prefetch = 0 : i64, scratch_operands = 0 : i64, tpu.core_type = #tpu.core_type<tc>, window_params = [{transform_indices = @transform_0, window_bounds = array<i64: 8, 32>}, {pipeline_mode = #tpu.pipeline_mode<synchronous>, transform_indices = @transform_1, window_bounds = array<i64: 32, 128>}, {pipeline_mode = #tpu.pipeline_mode<synchronous>, transform_indices = @transform_2, window_bounds = array<i64: 32, 128>}, {pipeline_mode = #tpu.pipeline_mode<synchronous>, transform_indices = @transform_3, window_bounds = array<i64: 1, 128>}, {transform_indices = @transform_4, window_bounds = array<i64: 8, 128>}]} {
    %c0 = arith.constant 0 : index
    %c0_0 = arith.constant 0 : index
    %0 = vector.load %arg1[%c0, %c0_0] : memref<8x32xf32, #tpu.memory_space<vmem>>, vector<8x32xf32>
    %c0_1 = arith.constant 0 : index
    %c0_2 = arith.constant 0 : index
    %1 = vector.load %arg2[%c0_1, %c0_2] : memref<32x128xf32, #tpu.memory_space<vmem>>, vector<32x128xf32>
    %cst = arith.constant dense<0.000000e+00> : vector<8x128xf32>
    %2 = tpu.matmul %0, %1, %cst {dimension_numbers = #tpu.dot_dimension_numbers<[1], [0], [0], [1], [0, 0, 1, 1], [], []>} : vector<8x32xf32>, vector<32x128xf32>, vector<8x128xf32> -> vector<8x128xf32>
    %3 = math.tanh %0 : vector<8x32xf32>
    %c0_3 = arith.constant 0 : index
    %c0_4 = arith.constant 0 : index
    %4 = vector.load %arg3[%c0_3, %c0_4] : memref<32x128xf32, #tpu.memory_space<vmem>>, vector<32x128xf32>
    %cst_5 = arith.constant dense<0.000000e+00> : vector<8x128xf32>
    %5 = tpu.matmul %3, %4, %cst_5 {dimension_numbers = #tpu.dot_dimension_numbers<[1], [0], [0], [1], [0, 0, 1, 1], [], []>} : vector<8x32xf32>, vector<32x128xf32>, vector<8x128xf32> -> vector<8x128xf32>
    %6 = arith.addf %2, %5 : vector<8x128xf32>
    %c0_6 = arith.constant 0 : index
    %c0_7 = arith.constant 0 : index
    %7 = vector.load %arg4[%c0_6, %c0_7] : memref<1x128xf32, #tpu.memory_space<vmem>>, vector<1x128xf32>
    %8 = vector.broadcast %7 : vector<1x128xf32> to vector<8x128xf32>
    %9 = arith.addf %6, %8 : vector<8x128xf32>
    %10 = vector.extract_strided_slice %9 {offsets = [0, 31], sizes = [8, 1], strides = [1, 1]} : vector<8x128xf32> to vector<8x1xf32>
    %11 = vector.extract_strided_slice %9 {offsets = [0, 30], sizes = [8, 1], strides = [1, 1]} : vector<8x128xf32> to vector<8x1xf32>
    %12 = arith.cmpf ogt, %10, %11 : vector<8x1xf32>
    %c64_i32 = arith.constant 64 : i32
    %13 = tpu.dynamic_rotate %9 by %c64_i32 dim 1 : vector<8x128xf32>, i32 -> vector<8x128xf32>
    %14 = vector.shape_cast %12 : vector<8x1xi1> to vector<8x1xi1>
    %15 = vector.broadcast %14 : vector<8x1xi1> to vector<8x128xi1>
    %16 = arith.select %15, %13, %9 : vector<8x128xi1>, vector<8x128xf32>
    %c0_8 = arith.constant 0 : index
    %c0_9 = arith.constant 0 : index
    %17 = vector.load %arg5[%c0_8, %c0_9] : memref<8x128xf32, #tpu.memory_space<vmem>>, vector<8x128xf32>
    tpu.vector_store %arg5[%c0_8, %c0_9], %16 {strides = array<i32>} : memref<8x128xf32, #tpu.memory_space<vmem>>, vector<8x128xf32>,
    return
  }
  func.func @transform_0(%arg0: i32) -> (i32, i32) {
    %c0_i32 = arith.constant 0 : i32
    %c0_i32_0 = arith.constant 0 : i32
    return %arg0, %c0_i32 : i32, i32
  }
  func.func @transform_1(%arg0: i32) -> (i32, i32) {
    %c0_i32 = arith.constant 0 : i32
    %c0_i32_0 = arith.constant 0 : i32
    %c0_i32_1 = arith.constant 0 : i32
    return %c0_i32, %c0_i32_0 : i32, i32
  }
  func.func @transform_2(%arg0: i32) -> (i32, i32) {
    %c0_i32 = arith.constant 0 : i32
    %c0_i32_0 = arith.constant 0 : i32
    %c0_i32_1 = arith.constant 0 : i32
    return %c0_i32, %c0_i32_0 : i32, i32
  }
  func.func @transform_3(%arg0: i32) -> (i32, i32) {
    %c0_i32 = arith.constant 0 : i32
    %c0_i32_0 = arith.constant 0 : i32
    %c0_i32_1 = arith.constant 0 : i32
    return %c0_i32, %c0_i32_0 : i32, i32
  }
  func.func @transform_4(%arg0: i32) -> (i32, i32) {
    %c0_i32 = arith.constant 0 : i32
    %c0_i32_0 = arith.constant 0 : i32
    return %arg0, %c0_i32 : i32, i32
  }
}

</mosaic_0001>

<bundles_post_ra>
// kernel: auxiliary_model_heads.1
= control target key start
LH: loop header
LB: loop body
LE: loop exit
PB: predicated region body
PF: predicated region fallthrough
CT: control target
= control target key end

     0   :  { %9 = vsyncpa [#allocation3], 0  ;;  %s284_s0 = inlined_call_operand.hbm [shape: f32[8,32], index: 0, kind: input, shape index: {}]   ;;  %s285_s1 = inlined_call_operand.hbm [shape: f32[32,128], index: 1, kind: input, shape index: {}]   ;;  %s286_s2 = inlined_call_operand.hbm [shape: f32[32,128], index: 2, kind: input, shape index: {}]   ;;  %s287_s3 = inlined_call_operand.vmem [shape: f32[1,128], index: 3, kind: input, shape index: {}]   ;;  %s288_s4 = inlined_call_operand.vmem [shape: f32[8,128], index: 4, kind: output, shape index: {}]  }
   0x1   :  { %10 = vsyncpa [#allocation5], 0  ;;  %s26_s17 = sshll.u32 %s285_s1, 4  ;;  %s235_s18 = smov [#allocation4]   ;;  %s27_s17 = int_to_ptr.hbm [resolvable:$true] %s26_s17 }
   0x2   :  { %s28_s19 = sshll.u32 %s235_s18, 4  ;;  %s16_s22 = sshll.u32 %s284_s0, 4  ;;  %s29_s19 = int_to_ptr.vmem [resolvable:$true] %s28_s19  ;;  %s17_s22 = int_to_ptr.hbm [resolvable:$true] %s16_s22 }
   0x3   :  { %s236_s23 = smov 128   ;;  %s237_s24 = smov 8  }
   0x4   :  { %34 = dma.hbm_to_vmem [thread:$0]  %s27_s17, 512, %s29_s19, [#allocation5], %s236_s23, %s236_s23, %s237_s24  }
   0x5   :  { %s238_s25 = smov [#allocation2]   ;;  %s39_s29 = sshll.u32 %s286_s2, 4  ;;  %s40_s29 = int_to_ptr.hbm [resolvable:$true] %s39_s29 }
   0x6   :  { %s18_s26 = sshll.u32 %s238_s25, 4  ;;  %s239_s1 = smov [#allocation6]   ;;  %s19_s26 = int_to_ptr.vmem [resolvable:$true] %s18_s26 }
   0x7   :  { %21 = dma.hbm_to_vmem [thread:$0]  %s17_s22, 128, %s19_s26, [#allocation3]  }
   0x8   :  { %s41_s30 = sshll.u32 %s239_s1, 4  ;;  %s42_s30 = int_to_ptr.vmem [resolvable:$true] %s41_s30 }
   0x9   :  { %47 = dma.hbm_to_vmem [thread:$0]  %s40_s29, 512, %s42_s30, [#allocation5], %s236_s23, %s236_s23, %s237_s24  }
   0xa   :  { %231 = dma.done.wait [#allocation3], 128  }
   0xb   :  { %232 = vsyncadd [#allocation3], 4294967168 }
   0xc   :  { %233 = dma.done.wait [#allocation5], 1024  }
   0xd   :  { %234 = vsyncadd [#allocation5], 4294966272  ;;  %v71_v0 = vld [vmem:[#allocation6 + $0x18] sm:$0xff]  ;;  %v70_v2 = vld [vmem:[#allocation6 + $0x10] sm:$0xff]  ;;  %vm72_vm0 = vcmask 261120   ;;  %s240_s5 = smov 64  }
   0xe   :  { %v66_v1 = vld [vmem:[#allocation4 + $0x18] sm:$0xff]  ;;  %88 = vmatpush.msra.mxu0 %v71_v0  ;;  %v65_v3 = vld [vmem:[#allocation4 + $0x10] sm:$0xff]  ;;  %v69_v4 = vld [vmem:[#allocation6 + $0x8] sm:$0xff]  ;;  %s241_s6 = smov 1   ;;  %v242_v15 = vmov 31   ;;  %v243_v17 = vmov 0  }
   0xf   :  { %111 = vmatpush.msra.mxu1 %v66_v1  ;;  %v64_v5 = vld [vmem:[#allocation4 + $0x8] sm:$0xff]  ;;  %v62_v6 = vld [vmem:[#allocation2] sm:$0xff]  ;;  %v68_v7 = vld [vmem:[#allocation6] sm:$0xff]  ;;  %155 = vset.pattern.permute.xlu0 %v242_v15 }
  0x10   :  { %89 = vmatpush.msra.mxu0 %v70_v2  ;;  %157 = vtanh.f32 %v62_v6  ;;  %v63_v8 = vld [vmem:[#allocation4] sm:$0xff]  ;;  %v156_v11 = vld [vmem:[%s287_s3] ss:$0 sm:$0xff] }
  0x11   :  { %112 = vmatpush.msra.mxu1 %v65_v3 }
  0x12   :  { %90 = vmatpush.msra.mxu0 %v69_v4 }
  0x13   :  { %113 = vmatpush.msra.mxu1 %v64_v5 }
  0x14   :  { %91 = vmatpush.msra.mxu0 %v68_v7 }
  0x15   :  { %114 = vmatpush.msra.mxu1 %v63_v8 }
  0x16   :  { %145 = vmatmul.msk.f32.vlgmr.msra.gmra.mxu1 %vm72_vm0, %v62_v6  ;;  %v158_v9 = vpop.eup %157 }
  0x17   :  { %144 = vmatmul.msk.f32.vlgmr.msra.gmra.mxu0 %vm72_vm0, %v158_v9 }
  0x93   :  { %v116_v10 = vpop.f32.mrf.mxu1 }
  0x94   :  { %v93_v12 = vpop.f32.mrf.mxu0 }
  0x95   :  { %v117_v13 = vadd.f32 %v116_v10, %v93_v12 }
  0x97   :  { %v123_v14 = vadd.f32 %v156_v11, %v117_v13 }
  0x99   :  { %129 = vrot.lane.b32.xlu1 %v123_v14, %s240_s5  ;;  %125 = vrot.lane.b32.xlu0 %v123_v14, %s241_s6 }
 0x10b   :  { %v126_v16 = vpop.permute.xlu0 %125  ;;  %v130_v20 = vpop.permute.xlu1 %129 }
 0x10c   :  { %vm128_vm1 = vcmp.gt.f32.partialorder %v123_v14, %v126_v16 }
 0x10d   :  { %v131_v18 = vsel %vm128_vm1, 1, %v243_v17 }
 0x10e   :  { %133 = vperm.xlu0 %155, %v131_v18  }
 0x180   :  { %v134_v19 = vpop.permute.xlu0 %133 }
 0x181   :  { %vm135_vm2 = vcmp.eq.s32.totalorder %v134_v19, 1 }
 0x182   :  { %v136_v21 = vsel %vm135_vm2, %v130_v20, %v123_v14 }
 0x183   :  { %137 = vst [vmem:[%s288_s4] sm:$0xff] %v136_v21 }
 0x184   :  { %142 = vsyncpa [#allocation3], 1 }
 0x185   :  { %143 = vsyncpa [#allocation5], 1 }

</bundles_post_ra>
